<compile_context>
chip_gen: v7x
topology: tpu7x:2x2x1
jax: 0.10.0
libtpu: 0.0.40
codegen_flags: <defaults>
</compile_context>

<pallas_src>
import functools

import jax
import jax.numpy as jnp
from jax import lax
from jax.experimental import pallas as pl
from jax.experimental.pallas import tpu as pltpu

LANE = 128          # TPU lane width; class axis is padded to this
NEG_BIG = -1e30     # effective -inf for masked (padding) lanes


def repeat_mask_kernel(p_ref, g_ref, idx_ref, soft_ref, hard_ref, *,
                       inv_tau, num_classes):
    """Batched gumbel-softmax over the lane axis + (first-)argmax.

    p_ref    : VMEM (1, LANE) f32 — lane-padded logits parameter (broadcast over rows)
    g_ref    : VMEM (B, LANE) f32 — precomputed Gumbel(0,1) noise
    idx_ref  : VMEM (B, 1)   i32 — output: argmax index per row
    soft_ref : VMEM (B, LANE) f32 — output: softmax((p + g) / tau)
    hard_ref : VMEM (B, LANE) f32 — output: hard one-hot at argmax
    """
    lane = lax.broadcasted_iota(jnp.int32, g_ref.shape, 1)
    valid = lane < num_classes

    x = p_ref[...] + g_ref[...]                       # (1,LANE)+(B,LANE) broadcast
    if inv_tau != 1.0:                                # static: dead code for tau=1
        x = x * jnp.float32(inv_tau)
    logits = jnp.where(valid, x, jnp.float32(NEG_BIG))

    # ---- argmax on the (exact) masked logits; first maximal lane ----------
    m = jnp.max(logits, axis=-1, keepdims=True)                       # (B,1)
    idx = jnp.min(jnp.where(logits == m, lane, jnp.int32(2 ** 30)),
                  axis=-1, keepdims=True)                             # (B,1)
    idx_ref[...] = idx

    # ---- soft sample: softmax over the class lanes -------------------------
    e = jnp.where(valid, jnp.exp(logits - m), jnp.float32(0.0))
    denom = jnp.sum(e, axis=-1, keepdims=True)                        # (B,1)
    soft_ref[...] = e * (jnp.float32(1.0) / denom)   # reciprocal of (B,1) then bcast mul

    # ---- hard sample: one-hot at argmax (forward value of hard=True) -------
    hard_ref[...] = jnp.where(lane == idx, jnp.float32(1.0), jnp.float32(0.0))


@functools.partial(jax.jit, static_argnames=("tau", "num_samples"))
def repeat_mask_sample(p, key, *, tau=1.0, num_samples=8):
    """Draw `num_samples` independent gumbel-softmax samples over parameter p.

    Returns (idx: (S,) i32, soft: (S, C) f32, hard_one_hot: (S, C) f32).
    """
    num_classes = int(p.shape[0])
    b = max(8, ((num_samples + 7) // 8) * 8)          # round batch up to sublane multiple

    p_pad = jnp.zeros((1, LANE), jnp.float32).at[0, :num_classes].set(
        p.astype(jnp.float32))
    g = jax.random.gumbel(key, (b, LANE), dtype=jnp.float32)

    kernel = functools.partial(repeat_mask_kernel,
                               inv_tau=float(1.0 / tau),
                               num_classes=num_classes)

    idx, soft, hard = pl.pallas_call(
        kernel,
        out_shape=(jax.ShapeDtypeStruct((b, 1), jnp.int32),
                   jax.ShapeDtypeStruct((b, LANE), jnp.float32),
                   jax.ShapeDtypeStruct((b, LANE), jnp.float32)),
        in_specs=[pl.BlockSpec(memory_space=pltpu.MemorySpace.VMEM),
                  pl.BlockSpec(memory_space=pltpu.MemorySpace.VMEM)],
        out_specs=(pl.BlockSpec(memory_space=pltpu.MemorySpace.VMEM),
                   pl.BlockSpec(memory_space=pltpu.MemorySpace.VMEM),
                   pl.BlockSpec(memory_space=pltpu.MemorySpace.VMEM)),
    )(p_pad, g)

    return (idx[:num_samples, 0],
            soft[:num_samples, :num_classes],
            hard[:num_samples, :num_classes])


def repeat_mask_forward(p, key, *, tau=1.0, hard=False):
    """Module forward: returns argmax(gumbel_softmax(p, tau, hard)) as a scalar.

    The argmax index is identical for hard=False / hard=True (softmax is monotone),
    so both paths come from the single fused kernel launch.
    """
    idx, _soft, _hard = repeat_mask_sample(p, key, tau=tau, num_samples=1)
    del hard  # forward return value (the index) does not depend on it
    return idx[0]


if __name__ == "__main__":
    num_classes = 8

    # Deterministic parameter init matching RepeatMask.__init__:
    # zeros with a 1 at the last class.
    p = jnp.zeros((num_classes,), jnp.float32).at[num_classes - 1].set(1.0)

    key = jax.random.PRNGKey(0)

    # Batched sampling: 8 independent gumbel-softmax draws in one kernel launch.
    idx, soft, hard = repeat_mask_sample(p, key, tau=1.0, num_samples=8)

    # Module-style forward (scalar index), soft and hard variants share the call.
    one_hot_index_soft = repeat_mask_forward(p, key, tau=1.0, hard=False)
    one_hot_index_hard = repeat_mask_forward(p, key, tau=1.0, hard=True)

    jax.block_until_ready((idx, soft, hard, one_hot_index_soft, one_hot_index_hard))

    # sanity checks
    assert idx.shape == (8,)
    assert soft.shape == (8, num_classes)
    assert hard.shape == (8, num_classes)
    assert bool(jnp.all((idx >= 0) & (idx < num_classes)))
    assert bool(jnp.all(jnp.abs(jnp.sum(soft, axis=-1) - 1.0) < 1e-4))
    assert bool(jnp.all(jnp.sum(hard, axis=-1) == 1.0))
    assert bool(jnp.all(jnp.argmax(hard, axis=-1) == idx))
    assert bool(jnp.all(jnp.argmax(soft, axis=-1) == idx))
    assert int(one_hot_index_soft) == int(one_hot_index_hard)
    assert 0 <= int(one_hot_index_soft) < num_classes

    print("KERNEL_OK")
</pallas_src>

<mosaic_0001>
module attributes {stable_mosaic.version = 11 : i64} {
  func.func @repeat_mask_kernel(%arg0: memref<1x128xf32, #tpu.memory_space<vmem>>, %arg1: memref<8x128xf32, #tpu.memory_space<vmem>>, %arg2: memref<8x1xi32, #tpu.memory_space<vmem>>, %arg3: memref<8x128xf32, #tpu.memory_space<vmem>>, %arg4: memref<8x128xf32, #tpu.memory_space<vmem>>) attributes {dimension_semantics = [], scalar_prefetch = 0 : i64, scratch_operands = 0 : i64, tpu.core_type = #tpu.core_type<tc>} {
    %0 = tpu.iota {dimensions = array<i32: 1>} : vector<8x128xi32>
    %c8_i32 = arith.constant 8 : i32
    %1 = vector.broadcast %c8_i32 : i32 to vector<8x128xi32>
    %2 = arith.cmpi slt, %0, %1 : vector<8x128xi32>
    %c0 = arith.constant 0 : index
    %c0_0 = arith.constant 0 : index
    %3 = vector.load %arg0[%c0, %c0_0] : memref<1x128xf32, #tpu.memory_space<vmem>>, vector<1x128xf32>
    %c0_1 = arith.constant 0 : index
    %c0_2 = arith.constant 0 : index
    %4 = vector.load %arg1[%c0_1, %c0_2] : memref<8x128xf32, #tpu.memory_space<vmem>>, vector<8x128xf32>
    %5 = vector.broadcast %3 : vector<1x128xf32> to vector<8x128xf32>
    %6 = arith.addf %5, %4 : vector<8x128xf32>
    %cst = arith.constant -1.000000e+30 : f32
    %7 = vector.broadcast %cst : f32 to vector<8x128xf32>
    %8 = arith.select %2, %6, %7 : vector<8x128xi1>, vector<8x128xf32>
    %cst_3 = arith.constant dense<0xFF800000> : vector<8xf32>
    %9 = vector.multi_reduction <maximumf>, %8, %cst_3 [1] : vector<8x128xf32> to vector<8xf32>
    %10 = vector.shape_cast %9 : vector<8xf32> to vector<8x1xf32>
    %11 = vector.broadcast %10 : vector<8x1xf32> to vector<8x128xf32>
    %12 = arith.cmpf oeq, %8, %11 : vector<8x128xf32>
    %c1073741824_i32 = arith.constant 1073741824 : i32
    %13 = vector.broadcast %c1073741824_i32 : i32 to vector<8x128xi32>
    %14 = arith.select %12, %0, %13 : vector<8x128xi1>, vector<8x128xi32>
    %cst_4 = arith.constant dense<2147483647> : vector<8xi32>
    %15 = vector.multi_reduction <minsi>, %14, %cst_4 [1] : vector<8x128xi32> to vector<8xi32>
    %16 = vector.shape_cast %15 : vector<8xi32> to vector<8x1xi32>
    %c0_5 = arith.constant 0 : index
    %c0_6 = arith.constant 0 : index
    %17 = vector.load %arg2[%c0_5, %c0_6] : memref<8x1xi32, #tpu.memory_space<vmem>>, vector<8x1xi32>
    tpu.vector_store %arg2[%c0_5, %c0_6], %16 {strides = array<i32>} : memref<8x1xi32, #tpu.memory_space<vmem>>, vector<8x1xi32>,
    %18 = vector.broadcast %10 : vector<8x1xf32> to vector<8x128xf32>
    %19 = arith.subf %8, %18 : vector<8x128xf32>
    %20 = math.exp %19 : vector<8x128xf32>
    %cst_7 = arith.constant 0.000000e+00 : f32
    %21 = vector.broadcast %cst_7 : f32 to vector<8x128xf32>
    %22 = arith.select %2, %20, %21 : vector<8x128xi1>, vector<8x128xf32>
    %cst_8 = arith.constant dense<0.000000e+00> : vector<8xf32>
    %23 = vector.multi_reduction <add>, %22, %cst_8 [1] : vector<8x128xf32> to vector<8xf32>
    %24 = vector.shape_cast %23 : vector<8xf32> to vector<8x1xf32>
    %cst_9 = arith.constant 1.000000e+00 : f32
    %25 = vector.broadcast %cst_9 : f32 to vector<8x1xf32>
    %26 = arith.divf %25, %24 : vector<8x1xf32>
    %27 = vector.broadcast %26 : vector<8x1xf32> to vector<8x128xf32>
    %28 = arith.mulf %22, %27 : vector<8x128xf32>
    %c0_10 = arith.constant 0 : index
    %c0_11 = arith.constant 0 : index
    %29 = vector.load %arg3[%c0_10, %c0_11] : memref<8x128xf32, #tpu.memory_space<vmem>>, vector<8x128xf32>
    tpu.vector_store %arg3[%c0_10, %c0_11], %28 {strides = array<i32>} : memref<8x128xf32, #tpu.memory_space<vmem>>, vector<8x128xf32>,
    %30 = vector.broadcast %16 : vector<8x1xi32> to vector<8x128xi32>
    %31 = arith.cmpi eq, %0, %30 : vector<8x128xi32>
    %cst_12 = arith.constant 1.000000e+00 : f32
    %cst_13 = arith.constant 0.000000e+00 : f32
    %32 = vector.broadcast %cst_12 : f32 to vector<8x128xf32>
    %33 = vector.broadcast %cst_13 : f32 to vector<8x128xf32>
    %34 = arith.select %31, %32, %33 : vector<8x128xi1>, vector<8x128xf32>
    %c0_14 = arith.constant 0 : index
    %c0_15 = arith.constant 0 : index
    %35 = vector.load %arg4[%c0_14, %c0_15] : memref<8x128xf32, #tpu.memory_space<vmem>>, vector<8x128xf32>
    tpu.vector_store %arg4[%c0_14, %c0_15], %34 {strides = array<i32>} : memref<8x128xf32, #tpu.memory_space<vmem>>, vector<8x128xf32>,
    return
  }
}

</mosaic_0001>

<bundles_post_ra>
// kernel: repeat_mask_sample.1
= control target key start
LH: loop header
LB: loop body
LE: loop exit
PB: predicated region body
PF: predicated region fallthrough
CT: control target
= control target key end

     0   :  { %10 = vsyncpa [#allocation3], 0  ;;  %v16_v0 = vlaneseq  ;;  %s211_s0 = inlined_call_operand.vmem [shape: f32[1,128], index: 0, kind: input, shape index: {}]   ;;  %s212_s1 = inlined_call_operand.vmem [shape: f32[8,128], index: 1, kind: input, shape index: {}]   ;;  %s213_s2 = inlined_call_operand.vmem [shape: s32[8,1], index: 2, kind: output, shape index: {0}]   ;;  %s214_s3 = inlined_call_operand.hbm [shape: f32[8,128], index: 3, kind: output, shape index: {1}]   ;;  %s215_s4 = inlined_call_operand.hbm [shape: f32[8,128], index: 4, kind: output, shape index: {2}]  }
   0x1   :  { %v94_v1 = vld [vmem:[%s211_s0] ss:$0 sm:$0xff] }
   0x2   :  { %v20_v2 = vld [vmem:[%s212_s1] sm:$0xff] }
   0x3   :  { %11 = vsyncpa [#allocation5], 0  ;;  %v27_v3 = vadd.f32 %v94_v1, %v20_v2  ;;  %v17_v4 = vand.u32 127, %v16_v0  ;;  %s150_s0 = smov [#allocation2]  }
   0x4   :  { %s70_s1 = sshll.u32 %s150_s0, 4  ;;  %s71_s1 = int_to_ptr.vmem [resolvable:$true] %s70_s1 }
   0x5   :  { %vm18_vm0 = vcmp.lt.s32.totalorder %v17_v4, 8  ;;  %s102_s19 = scalar_lea.vmem %s71_s1, 128  ;;  %p107_p1 = scmp.lt.s32.totalorder %s71_s1, %s71_s1 }
   0x6   :  { %v28_v5 = vsel %vm18_vm0, %v27_v3, -1e+30  ;;  %p103_p0 = scmp.ne.s32.totalorder %s71_s1, %s102_s19  ;;  %p108_p2 = scmp.lt.s32.totalorder %s102_s19, %s102_s19 }
   0x7   :  { %29 = vmax.xlane.f32.xlu0 %v28_v5 }
   0x8   :  { %p109_p3 = por %p108_p2, %p107_p1 }
   0xa   :  { %p110_p4 = pnand %p109_p3, %p103_p0 }
  0x94   :  { %v30_v6 = vpop.xlane.xlu0 %29 }
  0x95   :  { %vm31_vm1 = vcmp.eq.f32.partialorder %v28_v5, %v30_v6  ;;  %v49_v7 = vsub.f32 %v28_v5, %v30_v6 }
  0x96   :  { %v32_v8 = vsel %vm31_vm1, %v17_v4, 1073741824 }
  0x97   :  { %v50_v9 = vmul.f32 1.442695, %v49_v7  ;;  %v34_v10 = vshra.s32 %v32_v8, 16  ;;  %v33_v14 = vand.u32 65535, %v32_v8 }
  0x99   :  { %98 = vpow2.f32 %v50_v9  ;;  %v36_v11 = vcvt.s32.f32 %v34_v10  ;;  %v35_v16 = vcvt.s32.f32 %v33_v14 }
  0x9b   :  { %37 = vmin.xlane.f32.xlu0 %v36_v11 }
  0xa3   :  { %v99_v12 = vpop.eup %98 }
  0xa4   :  { %v52_v13 = vsel %vm18_vm0, %v99_v12, 0.0 }
  0xa5   :  { %53 = vadd.xlane.f32.xlu1 %v52_v13 }
 0x128   :  { %v38_v15 = vpop.xlane.xlu0 %37 }
 0x129   :  { %vm39_vm2 = vcmp.eq.f32.partialorder %v36_v11, %v38_v15 }
 0x12a   :  { %v40_v17 = vsel %vm39_vm2, %v35_v16, inf }
 0x12b   :  { %41 = vmin.xlane.f32.xlu1 %v40_v17 }
 0x132   :  { %v54_v18 = vpop.xlane.xlu1 %53 }
 0x133   :  { %100 = vrcp.f32 %v54_v18 }
 0x13d   :  { %v101_v19 = vpop.eup %100 }
 0x13e   :  { %v57_v20 = vmul.f32 %v101_v19, %v52_v13 }
 0x140   :  { %58 = vst [vmem:[#allocation2] sm:$0xff] %v57_v20 }
 0x141   :  { %113 = shalt.err (!%p110_p4)
}
 0x142   :  { %s114_s22 = scalar_lea.hbm %s214_s3, 128 }
 0x143   :  { %p115_p5 = scmp.ne.s32.totalorder %s214_s3, %s114_s22  ;;  %p118_p6 = scmp.lt.u32.totalorder %s114_s22, %s214_s3 }
 0x145   :  { %p120_p7 = pnand %p118_p6, %p115_p5 }
 0x147   :  { %123 = shalt.err (!%p120_p7)
}
 0x148   :  { %73 = dma.vmem_to_hbm [thread:$0]  %s71_s1, 128, %s214_s3, [#allocation3]   ;;  %v44_v21 = vcvt.f32.s32 %v38_v15  ;;  %vm47_vm3 = vcmask 7168   ;;  %v152_v26 = vmov 0.0  }
 0x149   :  { %s151_s29 = smov [#allocation4]  }
 0x14a   :  { %v45_v23 = vshll.u32 %v44_v21, 16  ;;  %s80_s30 = sshll.u32 %s151_s29, 4  ;;  %s81_s30 = int_to_ptr.vmem [resolvable:$true] %s80_s30 }
 0x14b   :  { %s124_s7 = scalar_lea.vmem %s81_s30, 128  ;;  %p129_p9 = scmp.lt.s32.totalorder %s81_s30, %s81_s30 }
 0x14c   :  { %p125_p8 = scmp.ne.s32.totalorder %s81_s30, %s124_s7  ;;  %p130_p10 = scmp.lt.s32.totalorder %s124_s7, %s124_s7 }
 0x14e   :  { %p131_p11 = por %p130_p10, %p129_p9 }
 0x150   :  { %p132_p12 = pnand %p131_p11, %p125_p8 }
 0x1b8   :  { %v42_v22 = vpop.xlane.xlu1 %41 }
 0x1b9   :  { %v43_v24 = vcvt.f32.s32 %v42_v22 }
 0x1bb   :  { %v46_v25 = vadd.s32 %v45_v23, %v43_v24 }
 0x1bd   :  { %48 = vst.msk [vmem:[%s213_s2] sm:$0xff] %vm47_vm3, %v46_v25  ;;  %vm59_vm4 = vcmp.eq.s32.totalorder %v17_v4, %v46_v25 }
 0x1be   :  { %v60_v27 = vsel %vm59_vm4, 1.0, %v152_v26 }
 0x1bf   :  { %61 = vst [vmem:[#allocation4] sm:$0xff] %v60_v27 }
 0x1c0   :  { %135 = shalt.err (!%p132_p12)
}
 0x1c1   :  { %s136_s9 = scalar_lea.hbm %s215_s4, 128 }
 0x1c2   :  { %p137_p13 = scmp.ne.s32.totalorder %s215_s4, %s136_s9  ;;  %p140_p0 = scmp.lt.u32.totalorder %s136_s9, %s215_s4 }
 0x1c4   :  { %p142_p1 = pnand %p140_p0, %p137_p13 }
 0x1c6   :  { %145 = shalt.err (!%p142_p1)
}
 0x1c7   :  { %83 = dma.vmem_to_hbm [thread:$0]  %s81_s30, 128, %s215_s4, [#allocation5]  }
 0x1c8   :  { %146 = dma.done.wait [#allocation3], 128  }
 0x1c9   :  { %147 = vsyncadd [#allocation3], 4294967168 }
 0x1ca   :  { %148 = dma.done.wait [#allocation5], 128  }
 0x1cb   :  { %149 = vsyncadd [#allocation5], 4294967168 }
 0x1cc   :  { %92 = vsyncpa [#allocation3], 1 }
 0x1cd   :  { %93 = vsyncpa [#allocation5], 1 }

</bundles_post_ra>
